<compile_context>
chip_gen: v7x
topology: tpu7x:2x2x1
jax: 0.10.0
libtpu: 0.0.40
codegen_flags: <defaults>
</compile_context>

<pallas_src>
import functools

import jax
import jax.numpy as jnp
from jax import lax
from jax.experimental import pallas as pl
from jax.experimental.pallas import tpu as pltpu


NOISE_DIM = 16
H1, H2, H3 = 128, 256, 512
OUTPUT_DIM = 42
LN_EPS = 1e-5
LEAKY_SLOPE = 0.1
LANE = 128


def _round_up(n, m):
    return ((n + m - 1) // m) * m


def _cdiv(a, b):
    return -(-a // b)


OUT_PAD = _round_up(OUTPUT_DIM, LANE)          # 128

# Layout of the packed (1, VEC_LEN) bias / LayerNorm-parameter slab.
# Every segment width is a multiple of 128 lanes, so in-kernel slices are
# vreg-aligned and free.
_VEC_SEGMENTS = (
    ("b1", H1), ("g1", H1), ("be1", H1),
    ("b2", H2), ("g2", H2), ("be2", H2),
    ("b3", H3), ("g3", H3), ("be3", H3),
    ("bo", OUT_PAD),
)
_VEC_OFF = {}
_cursor = 0
for _name, _size in _VEC_SEGMENTS:
    _VEC_OFF[_name] = (_cursor, _size)
    _cursor += _size
VEC_LEN = _cursor                               # 2816 = 22 * 128


def _vec(vec_ref, name):
    off, size = _VEC_OFF[name]
    return vec_ref[:, off:off + size]           # (1, size) f32, lane-aligned


def _leaky_relu(v):
    return jnp.where(v > 0, v, LEAKY_SLOPE * v)


def _layer_norm(v, gamma, beta):
    # one-pass variance: E[x^2] - mu^2 (both reductions independent)
    mu = jnp.mean(v, axis=-1, keepdims=True)
    ms = jnp.mean(v * v, axis=-1, keepdims=True)
    var = ms - mu * mu
    return (v - mu) * lax.rsqrt(var + LN_EPS) * gamma + beta


def generator_kernel(x_ref, wx_ref, wh1_ref, w3b_ref, wo_ref, vec_ref, out_ref):
    # x_ref  : (tile, noise_dim) f32     wx_ref : (noise_dim, H1+H2) bf16
    # wh1_ref: (H1, H2+H3)       bf16    w3b_ref: (H2, H3)           bf16
    # wo_ref : (H3, OUT_PAD)     bf16    vec_ref: (1, VEC_LEN)       f32
    x = x_ref[...].astype(jnp.bfloat16)

    # fused x-side matmul: [h1_pre | h2_x] = x @ [w1 | w2x]
    yx = jnp.dot(x, wx_ref[...], preferred_element_type=jnp.float32)
    h1 = _layer_norm(
        _leaky_relu(yx[:, :H1] + _vec(vec_ref, "b1")),
        _vec(vec_ref, "g1"), _vec(vec_ref, "be1"))
    # dropout = identity (eval mode)

    # fused h1-side matmul: [h2_h | h3_a] = h1 @ [w2h | w3a]
    yh1 = jnp.dot(h1.astype(jnp.bfloat16), wh1_ref[...],
                  preferred_element_type=jnp.float32)
    h2 = _layer_norm(
        _leaky_relu(yx[:, H1:H1 + H2] + yh1[:, :H2] + _vec(vec_ref, "b2")),
        _vec(vec_ref, "g2"), _vec(vec_ref, "be2"))

    # fc3(cat([h1, h2])) == h1 @ w3a + h2 @ w3b   (h1 part already in yh1)
    h3_pre = (yh1[:, H2:H2 + H3]
              + jnp.dot(h2.astype(jnp.bfloat16), w3b_ref[...],
                        preferred_element_type=jnp.float32)
              + _vec(vec_ref, "b3"))
    h3 = _layer_norm(_leaky_relu(h3_pre),
                     _vec(vec_ref, "g3"), _vec(vec_ref, "be3"))

    # fc_out -> tanh  (lane-dense padded output; pad columns stay exactly 0)
    out = jnp.tanh(
        jnp.dot(h3.astype(jnp.bfloat16), wo_ref[...],
                preferred_element_type=jnp.float32)
        + _vec(vec_ref, "bo"))
    out_ref[...] = out.astype(out_ref.dtype)


def init_params(key, noise_dim=NOISE_DIM, output_dim=OUTPUT_DIM):
    """Deterministic synthetic parameters (shapes match nn.Linear / nn.LayerNorm)."""
    ks = jax.random.split(key, 8)

    def linear(kw, kb, fan_in, fan_out):
        bound = 1.0 / jnp.sqrt(fan_in)
        # stored transposed: (in, out)
        w = jax.random.uniform(kw, (fan_in, fan_out), jnp.float32, -bound, bound)
        b = jax.random.uniform(kb, (1, fan_out), jnp.float32, -bound, bound)
        return w, b

    w1, b1 = linear(ks[0], ks[1], noise_dim, H1)
    w2, b2 = linear(ks[2], ks[3], noise_dim + H1, H2)
    w3, b3 = linear(ks[4], ks[5], H1 + H2, H3)
    wo, bo = linear(ks[6], ks[7], H3, output_dim)

    # split fc2 / fc3 weights to avoid in-kernel concat of activations
    # (fc2 sees cat([x, x1]); fc3 sees cat([x1, x2]))
    w2x, w2h = w2[:noise_dim], w2[noise_dim:]
    w3a, w3b = w3[:H1], w3[H1:]

    # LayerNorm params (PyTorch default init: ones / zeros)
    g1, be1 = jnp.ones((1, H1), jnp.float32), jnp.zeros((1, H1), jnp.float32)
    g2, be2 = jnp.ones((1, H2), jnp.float32), jnp.zeros((1, H2), jnp.float32)
    g3, be3 = jnp.ones((1, H3), jnp.float32), jnp.zeros((1, H3), jnp.float32)

    return dict(
        w1=w1, b1=b1, g1=g1, be1=be1,
        w2x=w2x, w2h=w2h, b2=b2, g2=g2, be2=be2,
        w3a=w3a, w3b=w3b, b3=b3, g3=g3, be3=be3,
        wo=wo, bo=bo,
    )


def pack_params(params):
    """One-time packing (call once, reuse across forward calls).

    Fuses weights along N, pads the output projection to 128 lanes, casts the
    matmul operands to bf16, and packs all (1, N) bias / LN vectors into one
    lane-aligned f32 slab — keeping all this HBM traffic out of the hot path.
    """
    out_dim = params["wo"].shape[1]
    pad = OUT_PAD - out_dim

    wx = jnp.concatenate([params["w1"], params["w2x"]], axis=1)    # (noise, H1+H2)
    wh1 = jnp.concatenate([params["w2h"], params["w3a"]], axis=1)  # (H1, H2+H3)
    wo = jnp.pad(params["wo"], ((0, 0), (0, pad)))                 # (H3, OUT_PAD)
    bo = jnp.pad(params["bo"], ((0, 0), (0, pad)))                 # (1, OUT_PAD)

    vec = jnp.concatenate(
        [params["b1"], params["g1"], params["be1"],
         params["b2"], params["g2"], params["be2"],
         params["b3"], params["g3"], params["be3"], bo],
        axis=1).astype(jnp.float32)                                # (1, VEC_LEN)
    assert vec.shape == (1, VEC_LEN), vec.shape

    return dict(
        wx=wx.astype(jnp.bfloat16),
        wh1=wh1.astype(jnp.bfloat16),
        w3b=params["w3b"].astype(jnp.bfloat16),
        wo=wo.astype(jnp.bfloat16),
        vec=vec,
    )


def _choose_tile(batch, requested):
    """Batch tile: multiple of 8, big enough to feed the MXU M dimension, and
    split into an EVEN, balanced number of >=2 grid steps when the batch
    allows so both v7x TensorCores get equal work (no lone remainder step)."""
    if batch <= 8:
        return 8
    steps = _cdiv(batch, requested)
    if steps < 2:
        steps = 2
    elif steps % 2:
        steps += 1
    return max(8, _round_up(_cdiv(batch, steps), 8))


@functools.partial(jax.jit, static_argnames=("batch_tile", "out_dim"))
def generator_forward(x, packed, batch_tile=1024, out_dim=OUTPUT_DIM):
    B, noise_dim = x.shape
    out_pad = packed["wo"].shape[1]

    tile = _choose_tile(B, batch_tile)
    grid = (_cdiv(B, tile),)

    def resident(shape):
        # full weight/param block, same block index for every grid step
        return pl.BlockSpec(shape, lambda i: (0, 0))

    in_specs = [
        pl.BlockSpec((tile, noise_dim), lambda i: (i, 0)),   # x (batch-tiled)
        resident(packed["wx"].shape),
        resident(packed["wh1"].shape),
        resident(packed["w3b"].shape),
        resident(packed["wo"].shape),
        resident(packed["vec"].shape),
    ]
    out_specs = pl.BlockSpec((tile, out_pad), lambda i: (i, 0))

    out_padded = pl.pallas_call(
        generator_kernel,
        out_shape=jax.ShapeDtypeStruct((B, out_pad), jnp.float32),
        grid_spec=pltpu.PrefetchScalarGridSpec(
            num_scalar_prefetch=0,
            grid=grid,
            in_specs=in_specs,
            out_specs=out_specs,
        ),
        compiler_params=pltpu.CompilerParams(
            dimension_semantics=("parallel",),
            # above v5e's 16 MiB scoped default; equal to v6e/v7x default
            vmem_limit_bytes=32 * 1024 * 1024,
        ),
    )(x, packed["wx"], packed["wh1"], packed["w3b"], packed["wo"], packed["vec"])

    return out_padded[:, :out_dim]


def generator_reference(x, params):
    """Pure-JAX f32 reference of the same forward pass (eval-mode dropout)."""

    def ln(v, gamma, beta):
        mu = jnp.mean(v, axis=-1, keepdims=True)
        var = jnp.mean((v - mu) ** 2, axis=-1, keepdims=True)
        return (v - mu) * lax.rsqrt(var + LN_EPS) * gamma + beta

    h1 = _leaky_relu(x @ params["w1"] + params["b1"])
    h1 = ln(h1, params["g1"], params["be1"])
    h2 = _leaky_relu(x @ params["w2x"] + h1 @ params["w2h"] + params["b2"])
    h2 = ln(h2, params["g2"], params["be2"])
    h3 = _leaky_relu(h1 @ params["w3a"] + h2 @ params["w3b"] + params["b3"])
    h3 = ln(h3, params["g3"], params["be3"])
    return jnp.tanh(h3 @ params["wo"] + params["bo"])


if __name__ == "__main__":
    key = jax.random.PRNGKey(0)
    k_param, k_x, k_x2 = jax.random.split(key, 3)

    params = init_params(k_param)
    packed = pack_params(params)          # one-time packing, outside hot path

    # small-batch / single-grid-step path
    batch = 8
    x = jax.random.normal(k_x, (batch, NOISE_DIM), jnp.float32)
    out = generator_forward(x, packed)
    jax.block_until_ready(out)
    assert out.shape == (batch, OUTPUT_DIM), out.shape
    ref = generator_reference(x, params)
    # bf16 MXU operands vs f32 reference -> loosened tolerance
    assert jnp.allclose(out, ref, atol=3e-2, rtol=3e-2), float(
        jnp.max(jnp.abs(out - ref)))

    # multi-step grid path (2 balanced steps, last block has OOB remainder rows)
    batch2 = 40
    x2 = jax.random.normal(k_x2, (batch2, NOISE_DIM), jnp.float32)
    out2 = generator_forward(x2, packed)
    jax.block_until_ready(out2)
    assert out2.shape == (batch2, OUTPUT_DIM), out2.shape
    ref2 = generator_reference(x2, params)
    assert jnp.allclose(out2, ref2, atol=3e-2, rtol=3e-2), float(
        jnp.max(jnp.abs(out2 - ref2)))

    print("KERNEL_OK")
</pallas_src>

<mosaic_0001>
module attributes {stable_mosaic.version = 11 : i64} {
  func.func @generator_kernel(%arg0: i32, %arg1: memref<8x16xf32, #tpu.memory_space<vmem>>, %arg2: memref<16x384xbf16, #tpu.memory_space<vmem>>, %arg3: memref<128x768xbf16, #tpu.memory_space<vmem>>, %arg4: memref<256x512xbf16, #tpu.memory_space<vmem>>, %arg5: memref<512x128xbf16, #tpu.memory_space<vmem>>, %arg6: memref<1x2816xf32, #tpu.memory_space<vmem>>, %arg7: memref<8x128xf32, #tpu.memory_space<vmem>>) attributes {dimension_semantics = [#tpu.dimension_semantics<parallel>], iteration_bounds = array<i64: 1>, scalar_prefetch = 0 : i64, scratch_operands = 0 : i64, tpu.core_type = #tpu.core_type<tc>, window_params = [{transform_indices = @transform_0, window_bounds = array<i64: 8, 16>}, {pipeline_mode = #tpu.pipeline_mode<synchronous>, transform_indices = @transform_1, window_bounds = array<i64: 16, 384>}, {pipeline_mode = #tpu.pipeline_mode<synchronous>, transform_indices = @transform_2, window_bounds = array<i64: 128, 768>}, {pipeline_mode = #tpu.pipeline_mode<synchronous>, transform_indices = @transform_3, window_bounds = array<i64: 256, 512>}, {pipeline_mode = #tpu.pipeline_mode<synchronous>, transform_indices = @transform_4, window_bounds = array<i64: 512, 128>}, {pipeline_mode = #tpu.pipeline_mode<synchronous>, transform_indices = @transform_5, window_bounds = array<i64: 1, 2816>}, {transform_indices = @transform_6, window_bounds = array<i64: 8, 128>}]} {
    %c0 = arith.constant 0 : index
    %c0_0 = arith.constant 0 : index
    %0 = vector.load %arg1[%c0, %c0_0] : memref<8x16xf32, #tpu.memory_space<vmem>>, vector<8x16xf32>
    %1 = arith.truncf %0 : vector<8x16xf32> to vector<8x16xbf16>
    %c0_1 = arith.constant 0 : index
    %c0_2 = arith.constant 0 : index
    %2 = vector.load %arg2[%c0_1, %c0_2] : memref<16x384xbf16, #tpu.memory_space<vmem>>, vector<16x384xbf16>
    %cst = arith.constant dense<0.000000e+00> : vector<8x384xf32>
    %3 = tpu.matmul %1, %2, %cst {dimension_numbers = #tpu.dot_dimension_numbers<[1], [0], [0], [1], [0, 0, 1, 1], [], []>} : vector<8x16xbf16>, vector<16x384xbf16>, vector<8x384xf32> -> vector<8x384xf32>
    %4 = vector.extract_strided_slice %3 {offsets = [0, 0], sizes = [8, 128], strides = [1, 1]} : vector<8x384xf32> to vector<8x128xf32>
    %c0_3 = arith.constant 0 : index
    %c0_4 = arith.constant 0 : index
    %5 = vector.load %arg6[%c0_3, %c0_4] : memref<1x2816xf32, #tpu.memory_space<vmem>>, vector<1x128xf32>
    %6 = vector.broadcast %5 : vector<1x128xf32> to vector<8x128xf32>
    %7 = arith.addf %4, %6 : vector<8x128xf32>
    %cst_5 = arith.constant 0.000000e+00 : f32
    %8 = vector.broadcast %cst_5 : f32 to vector<8x128xf32>
    %9 = arith.cmpf ogt, %7, %8 : vector<8x128xf32>
    %cst_6 = arith.constant 1.000000e-01 : f32
    %10 = vector.broadcast %cst_6 : f32 to vector<8x128xf32>
    %11 = arith.mulf %10, %7 : vector<8x128xf32>
    %12 = arith.select %9, %7, %11 : vector<8x128xi1>, vector<8x128xf32>
    %c0_7 = arith.constant 0 : index
    %c128 = arith.constant 128 : index
    %13 = vector.load %arg6[%c0_7, %c128] : memref<1x2816xf32, #tpu.memory_space<vmem>>, vector<1x128xf32>
    %c0_8 = arith.constant 0 : index
    %c256 = arith.constant 256 : index
    %14 = vector.load %arg6[%c0_8, %c256] : memref<1x2816xf32, #tpu.memory_space<vmem>>, vector<1x128xf32>
    %cst_9 = arith.constant dense<0.000000e+00> : vector<8xf32>
    %15 = vector.multi_reduction <add>, %12, %cst_9 [1] : vector<8x128xf32> to vector<8xf32>
    %16 = vector.shape_cast %15 : vector<8xf32> to vector<8x1xf32>
    %cst_10 = arith.constant 1.280000e+02 : f32
    %17 = vector.broadcast %cst_10 : f32 to vector<8x1xf32>
    %18 = arith.divf %16, %17 : vector<8x1xf32>
    %19 = arith.mulf %12, %12 : vector<8x128xf32>
    %cst_11 = arith.constant dense<0.000000e+00> : vector<8xf32>
    %20 = vector.multi_reduction <add>, %19, %cst_11 [1] : vector<8x128xf32> to vector<8xf32>
    %21 = vector.shape_cast %20 : vector<8xf32> to vector<8x1xf32>
    %cst_12 = arith.constant 1.280000e+02 : f32
    %22 = vector.broadcast %cst_12 : f32 to vector<8x1xf32>
    %23 = arith.divf %21, %22 : vector<8x1xf32>
    %24 = arith.mulf %18, %18 : vector<8x1xf32>
    %25 = arith.subf %23, %24 : vector<8x1xf32>
    %26 = vector.broadcast %18 : vector<8x1xf32> to vector<8x128xf32>
    %27 = arith.subf %12, %26 : vector<8x128xf32>
    %cst_13 = arith.constant 9.99999974E-6 : f32
    %28 = vector.broadcast %cst_13 : f32 to vector<8x1xf32>
    %29 = arith.addf %25, %28 : vector<8x1xf32>
    %30 = math.rsqrt %29 : vector<8x1xf32>
    %31 = vector.broadcast %30 : vector<8x1xf32> to vector<8x128xf32>
    %32 = arith.mulf %27, %31 : vector<8x128xf32>
    %33 = vector.broadcast %13 : vector<1x128xf32> to vector<8x128xf32>
    %34 = arith.mulf %32, %33 : vector<8x128xf32>
    %35 = vector.broadcast %14 : vector<1x128xf32> to vector<8x128xf32>
    %36 = arith.addf %34, %35 : vector<8x128xf32>
    %37 = arith.truncf %36 : vector<8x128xf32> to vector<8x128xbf16>
    %c0_14 = arith.constant 0 : index
    %c0_15 = arith.constant 0 : index
    %38 = vector.load %arg3[%c0_14, %c0_15] : memref<128x768xbf16, #tpu.memory_space<vmem>>, vector<128x768xbf16>
    %cst_16 = arith.constant dense<0.000000e+00> : vector<8x768xf32>
    %39 = tpu.matmul %37, %38, %cst_16 {dimension_numbers = #tpu.dot_dimension_numbers<[1], [0], [0], [1], [0, 0, 1, 1], [], []>} : vector<8x128xbf16>, vector<128x768xbf16>, vector<8x768xf32> -> vector<8x768xf32>
    %40 = vector.extract_strided_slice %3 {offsets = [0, 128], sizes = [8, 256], strides = [1, 1]} : vector<8x384xf32> to vector<8x256xf32>
    %41 = vector.extract_strided_slice %39 {offsets = [0, 0], sizes = [8, 256], strides = [1, 1]} : vector<8x768xf32> to vector<8x256xf32>
    %42 = arith.addf %40, %41 : vector<8x256xf32>
    %c0_17 = arith.constant 0 : index
    %c384 = arith.constant 384 : index
    %43 = vector.load %arg6[%c0_17, %c384] : memref<1x2816xf32, #tpu.memory_space<vmem>>, vector<1x256xf32>
    %44 = vector.broadcast %43 : vector<1x256xf32> to vector<8x256xf32>
    %45 = arith.addf %42, %44 : vector<8x256xf32>
    %cst_18 = arith.constant 0.000000e+00 : f32
    %46 = vector.broadcast %cst_18 : f32 to vector<8x256xf32>
    %47 = arith.cmpf ogt, %45, %46 : vector<8x256xf32>
    %cst_19 = arith.constant 1.000000e-01 : f32
    %48 = vector.broadcast %cst_19 : f32 to vector<8x256xf32>
    %49 = arith.mulf %48, %45 : vector<8x256xf32>
    %50 = arith.select %47, %45, %49 : vector<8x256xi1>, vector<8x256xf32>
    %c0_20 = arith.constant 0 : index
    %c640 = arith.constant 640 : index
    %51 = vector.load %arg6[%c0_20, %c640] : memref<1x2816xf32, #tpu.memory_space<vmem>>, vector<1x256xf32>
    %c0_21 = arith.constant 0 : index
    %c896 = arith.constant 896 : index
    %52 = vector.load %arg6[%c0_21, %c896] : memref<1x2816xf32, #tpu.memory_space<vmem>>, vector<1x256xf32>
    %cst_22 = arith.constant dense<0.000000e+00> : vector<8xf32>
    %53 = vector.multi_reduction <add>, %50, %cst_22 [1] : vector<8x256xf32> to vector<8xf32>
    %54 = vector.shape_cast %53 : vector<8xf32> to vector<8x1xf32>
    %cst_23 = arith.constant 2.560000e+02 : f32
    %55 = vector.broadcast %cst_23 : f32 to vector<8x1xf32>
    %56 = arith.divf %54, %55 : vector<8x1xf32>
    %57 = arith.mulf %50, %50 : vector<8x256xf32>
    %cst_24 = arith.constant dense<0.000000e+00> : vector<8xf32>
    %58 = vector.multi_reduction <add>, %57, %cst_24 [1] : vector<8x256xf32> to vector<8xf32>
    %59 = vector.shape_cast %58 : vector<8xf32> to vector<8x1xf32>
    %cst_25 = arith.constant 2.560000e+02 : f32
    %60 = vector.broadcast %cst_25 : f32 to vector<8x1xf32>
    %61 = arith.divf %59, %60 : vector<8x1xf32>
    %62 = arith.mulf %56, %56 : vector<8x1xf32>
    %63 = arith.subf %61, %62 : vector<8x1xf32>
    %64 = vector.broadcast %56 : vector<8x1xf32> to vector<8x256xf32>
    %65 = arith.subf %50, %64 : vector<8x256xf32>
    %cst_26 = arith.constant 9.99999974E-6 : f32
    %66 = vector.broadcast %cst_26 : f32 to vector<8x1xf32>
    %67 = arith.addf %63, %66 : vector<8x1xf32>
    %68 = math.rsqrt %67 : vector<8x1xf32>
    %69 = vector.broadcast %68 : vector<8x1xf32> to vector<8x256xf32>
    %70 = arith.mulf %65, %69 : vector<8x256xf32>
    %71 = vector.broadcast %51 : vector<1x256xf32> to vector<8x256xf32>
    %72 = arith.mulf %70, %71 : vector<8x256xf32>
    %73 = vector.broadcast %52 : vector<1x256xf32> to vector<8x256xf32>
    %74 = arith.addf %72, %73 : vector<8x256xf32>
    %75 = vector.extract_strided_slice %39 {offsets = [0, 256], sizes = [8, 512], strides = [1, 1]} : vector<8x768xf32> to vector<8x512xf32>
    %76 = arith.truncf %74 : vector<8x256xf32> to vector<8x256xbf16>
    %c0_27 = arith.constant 0 : index
    %c0_28 = arith.constant 0 : index
    %77 = vector.load %arg4[%c0_27, %c0_28] : memref<256x512xbf16, #tpu.memory_space<vmem>>, vector<256x512xbf16>
    %cst_29 = arith.constant dense<0.000000e+00> : vector<8x512xf32>
    %78 = tpu.matmul %76, %77, %cst_29 {dimension_numbers = #tpu.dot_dimension_numbers<[1], [0], [0], [1], [0, 0, 1, 1], [], []>} : vector<8x256xbf16>, vector<256x512xbf16>, vector<8x512xf32> -> vector<8x512xf32>
    %79 = arith.addf %75, %78 : vector<8x512xf32>
    %c0_30 = arith.constant 0 : index
    %c1152 = arith.constant 1152 : index
    %80 = vector.load %arg6[%c0_30, %c1152] : memref<1x2816xf32, #tpu.memory_space<vmem>>, vector<1x512xf32>
    %81 = vector.broadcast %80 : vector<1x512xf32> to vector<8x512xf32>
    %82 = arith.addf %79, %81 : vector<8x512xf32>
    %cst_31 = arith.constant 0.000000e+00 : f32
    %83 = vector.broadcast %cst_31 : f32 to vector<8x512xf32>
    %84 = arith.cmpf ogt, %82, %83 : vector<8x512xf32>
    %cst_32 = arith.constant 1.000000e-01 : f32
    %85 = vector.broadcast %cst_32 : f32 to vector<8x512xf32>
    %86 = arith.mulf %85, %82 : vector<8x512xf32>
    %87 = arith.select %84, %82, %86 : vector<8x512xi1>, vector<8x512xf32>
    %c0_33 = arith.constant 0 : index
    %c1664 = arith.constant 1664 : index
    %88 = vector.load %arg6[%c0_33, %c1664] : memref<1x2816xf32, #tpu.memory_space<vmem>>, vector<1x512xf32>
    %c0_34 = arith.constant 0 : index
    %c2176 = arith.constant 2176 : index
    %89 = vector.load %arg6[%c0_34, %c2176] : memref<1x2816xf32, #tpu.memory_space<vmem>>, vector<1x512xf32>
    %cst_35 = arith.constant dense<0.000000e+00> : vector<8xf32>
    %90 = vector.multi_reduction <add>, %87, %cst_35 [1] : vector<8x512xf32> to vector<8xf32>
    %91 = vector.shape_cast %90 : vector<8xf32> to vector<8x1xf32>
    %cst_36 = arith.constant 5.120000e+02 : f32
    %92 = vector.broadcast %cst_36 : f32 to vector<8x1xf32>
    %93 = arith.divf %91, %92 : vector<8x1xf32>
    %94 = arith.mulf %87, %87 : vector<8x512xf32>
    %cst_37 = arith.constant dense<0.000000e+00> : vector<8xf32>
    %95 = vector.multi_reduction <add>, %94, %cst_37 [1] : vector<8x512xf32> to vector<8xf32>
    %96 = vector.shape_cast %95 : vector<8xf32> to vector<8x1xf32>
    %cst_38 = arith.constant 5.120000e+02 : f32
    %97 = vector.broadcast %cst_38 : f32 to vector<8x1xf32>
    %98 = arith.divf %96, %97 : vector<8x1xf32>
    %99 = arith.mulf %93, %93 : vector<8x1xf32>
    %100 = arith.subf %98, %99 : vector<8x1xf32>
    %101 = vector.broadcast %93 : vector<8x1xf32> to vector<8x512xf32>
    %102 = arith.subf %87, %101 : vector<8x512xf32>
    %cst_39 = arith.constant 9.99999974E-6 : f32
    %103 = vector.broadcast %cst_39 : f32 to vector<8x1xf32>
    %104 = arith.addf %100, %103 : vector<8x1xf32>
    %105 = math.rsqrt %104 : vector<8x1xf32>
    %106 = vector.broadcast %105 : vector<8x1xf32> to vector<8x512xf32>
    %107 = arith.mulf %102, %106 : vector<8x512xf32>
    %108 = vector.broadcast %88 : vector<1x512xf32> to vector<8x512xf32>
    %109 = arith.mulf %107, %108 : vector<8x512xf32>
    %110 = vector.broadcast %89 : vector<1x512xf32> to vector<8x512xf32>
    %111 = arith.addf %109, %110 : vector<8x512xf32>
    %112 = arith.truncf %111 : vector<8x512xf32> to vector<8x512xbf16>
    %c0_40 = arith.constant 0 : index
    %c0_41 = arith.constant 0 : index
    %113 = vector.load %arg5[%c0_40, %c0_41] : memref<512x128xbf16, #tpu.memory_space<vmem>>, vector<512x128xbf16>
    %cst_42 = arith.constant dense<0.000000e+00> : vector<8x128xf32>
    %114 = tpu.matmul %112, %113, %cst_42 {dimension_numbers = #tpu.dot_dimension_numbers<[1], [0], [0], [1], [0, 0, 1, 1], [], []>} : vector<8x512xbf16>, vector<512x128xbf16>, vector<8x128xf32> -> vector<8x128xf32>
    %c0_43 = arith.constant 0 : index
    %c2688 = arith.constant 2688 : index
    %115 = vector.load %arg6[%c0_43, %c2688] : memref<1x2816xf32, #tpu.memory_space<vmem>>, vector<1x128xf32>
    %116 = vector.broadcast %115 : vector<1x128xf32> to vector<8x128xf32>
    %117 = arith.addf %114, %116 : vector<8x128xf32>
    %118 = math.tanh %117 : vector<8x128xf32>
    %c0_44 = arith.constant 0 : index
    %c0_45 = arith.constant 0 : index
    %119 = vector.load %arg7[%c0_44, %c0_45] : memref<8x128xf32, #tpu.memory_space<vmem>>, vector<8x128xf32>
    tpu.vector_store %arg7[%c0_44, %c0_45], %118 {strides = array<i32>} : memref<8x128xf32, #tpu.memory_space<vmem>>, vector<8x128xf32>,
    return
  }
  func.func @transform_0(%arg0: i32) -> (i32, i32) {
    %c0_i32 = arith.constant 0 : i32
    %c0_i32_0 = arith.constant 0 : i32
    return %arg0, %c0_i32 : i32, i32
  }
  func.func @transform_1(%arg0: i32) -> (i32, i32) {
    %c0_i32 = arith.constant 0 : i32
    %c0_i32_0 = arith.constant 0 : i32
    %c0_i32_1 = arith.constant 0 : i32
    return %c0_i32, %c0_i32_0 : i32, i32
  }
  func.func @transform_2(%arg0: i32) -> (i32, i32) {
    %c0_i32 = arith.constant 0 : i32
    %c0_i32_0 = arith.constant 0 : i32
    %c0_i32_1 = arith.constant 0 : i32
    return %c0_i32, %c0_i32_0 : i32, i32
  }
  func.func @transform_3(%arg0: i32) -> (i32, i32) {
    %c0_i32 = arith.constant 0 : i32
    %c0_i32_0 = arith.constant 0 : i32
    %c0_i32_1 = arith.constant 0 : i32
    return %c0_i32, %c0_i32_0 : i32, i32
  }
  func.func @transform_4(%arg0: i32) -> (i32, i32) {
    %c0_i32 = arith.constant 0 : i32
    %c0_i32_0 = arith.constant 0 : i32
    %c0_i32_1 = arith.constant 0 : i32
    return %c0_i32, %c0_i32_0 : i32, i32
  }
  func.func @transform_5(%arg0: i32) -> (i32, i32) {
    %c0_i32 = arith.constant 0 : i32
    %c0_i32_0 = arith.constant 0 : i32
    %c0_i32_1 = arith.constant 0 : i32
    return %c0_i32, %c0_i32_0 : i32, i32
  }
  func.func @transform_6(%arg0: i32) -> (i32, i32) {
    %c0_i32 = arith.constant 0 : i32
    %c0_i32_0 = arith.constant 0 : i32
    return %arg0, %c0_i32 : i32, i32
  }
}

</mosaic_0001>

<bundles_post_ra>
// kernel: generator_forward.1
= control target key start
LH: loop header
LB: loop body
LE: loop exit
PB: predicated region body
PF: predicated region fallthrough
CT: control target
= control target key end

     0   :  { %11 = vsyncpa [#allocation3], 0  ;;  %s2529_s0 = inlined_call_operand.hbm [shape: f32[8,16], index: 0, kind: input, shape index: {}]   ;;  %s2530_s1 = inlined_call_operand.hbm [shape: bf16[16,384], index: 1, kind: input, shape index: {}]   ;;  %s2531_s2 = inlined_call_operand.hbm [shape: bf16[128,768], index: 2, kind: input, shape index: {}]   ;;  %s2532_s3 = inlined_call_operand.hbm [shape: bf16[256,512], index: 3, kind: input, shape index: {}]   ;;  %s2533_s4 = inlined_call_operand.hbm [shape: bf16[512,128], index: 4, kind: input, shape index: {}]   ;;  %s2534_s5 = inlined_call_operand.hbm [shape: f32[1,2816], index: 5, kind: input, shape index: {}]   ;;  %s2535_s6 = inlined_call_operand.hbm [shape: f32[8,128], index: 6, kind: output, shape index: {}]  }
   0x1   :  { %12 = vsyncpa [#allocation6], 0 }
   0x2   :  { %13 = vsyncpa [#allocation9], 0 }
   0x3   :  { %14 = vsyncpa [#allocation12], 0 }
   0x4   :  { %15 = vsyncpa [#allocation4], 0  ;;  %s2289_s21 = smov [#allocation5]   ;;  %s2125_s25 = scalar_lea.hbm %s2530_s1, 384 }
   0x5   :  { %s31_s22 = sshll.u32 %s2289_s21, 4  ;;  %p2126_p0 = scmp.ne.s32.totalorder %s2530_s1, %s2125_s25  ;;  %s32_s22 = int_to_ptr.vmem [resolvable:$true] %s31_s22 }
   0x6   :  { %p2129_p1 = scmp.lt.u32.totalorder %s2125_s25, %s2530_s1 }
   0x8   :  { %p2131_p2 = pnand %p2129_p1, %p2126_p0 }
   0xa   :  { %2134 = shalt.err (!%p2131_p2)
}
   0xb   :  { %s2135_s30 = scalar_lea.vmem %s32_s22, 384  ;;  %p2140_p4 = scmp.lt.s32.totalorder %s32_s22, %s32_s22 }
   0xc   :  { %p2136_p3 = scmp.ne.s32.totalorder %s32_s22, %s2135_s30  ;;  %p2141_p5 = scmp.lt.s32.totalorder %s2135_s30, %s2135_s30 }
   0xe   :  { %p2142_p6 = por %p2141_p5, %p2140_p4 }
  0x10   :  { %p2143_p7 = pnand %p2142_p6, %p2136_p3 }
  0x12   :  { %2146 = shalt.err (!%p2143_p7)
}
  0x13   :  { %s2290_s7 = smov 192   ;;  %s2291_s8 = smov 12  }
  0x14   :  { %37 = dma.hbm_to_vmem [thread:$0]  %s2530_s1, 384, %s32_s22, [#allocation6], %s2290_s7, %s2290_s7, %s2291_s8  }
  0x15   :  { %s2292_s11 = smov [#allocation8]   ;;  %s2147_s15 = scalar_lea.hbm %s2532_s3, 8192 }
  0x16   :  { %s55_s12 = sshll.u32 %s2292_s11, 4  ;;  %p2148_p8 = scmp.ne.s32.totalorder %s2532_s3, %s2147_s15  ;;  %s56_s12 = int_to_ptr.vmem [resolvable:$true] %s55_s12 }
  0x17   :  { %p2151_p9 = scmp.lt.u32.totalorder %s2147_s15, %s2532_s3 }
  0x19   :  { %p2153_p10 = pnand %p2151_p9, %p2148_p8 }
  0x1b   :  { %2156 = shalt.err (!%p2153_p10)
}
  0x1c   :  { %s2157_s20 = scalar_lea.vmem %s56_s12, 8192  ;;  %p2162_p12 = scmp.lt.s32.totalorder %s56_s12, %s56_s12 }
  0x1d   :  { %p2158_p11 = scmp.ne.s32.totalorder %s56_s12, %s2157_s20  ;;  %p2163_p13 = scmp.lt.s32.totalorder %s2157_s20, %s2157_s20 }
  0x1f   :  { %p2164_p0 = por %p2163_p13, %p2162_p12 }
  0x21   :  { %p2165_p1 = pnand %p2164_p0, %p2158_p11 }
  0x23   :  { %2168 = shalt.err (!%p2165_p1)
}
  0x24   :  { %s2293_s1 = smov 256   ;;  %s2294_s21 = smov 16  }
  0x25   :  { %61 = dma.hbm_to_vmem [thread:$0]  %s2532_s3, 8192, %s56_s12, [#allocation9], %s2293_s1, %s2293_s1, %s2294_s21  }
  0x26   :  { %s2295_s24 = smov [#allocation2]   ;;  %s2296_s26 = smov [#allocation7]  }
  0x27   :  { %s22_s25 = sshll.u32 %s2295_s24, 4  ;;  %s43_s27 = sshll.u32 %s2296_s26, 4  ;;  %s23_s25 = int_to_ptr.vmem [resolvable:$true] %s22_s25  ;;  %s2366_s27 = int_to_ptr.vmem [resolvable:$true] %s43_s27 }
  0x28   :  { %s2169_s30 = scalar_lea.hbm %s2529_s0, 128 }
  0x29   :  { %p2170_p2 = scmp.ne.s32.totalorder %s2529_s0, %s2169_s30  ;;  %p2173_p3 = scmp.lt.u32.totalorder %s2169_s30, %s2529_s0 }
  0x2b   :  { %p2175_p4 = pnand %p2173_p3, %p2170_p2 }
  0x2d   :  { %2178 = shalt.err (!%p2175_p4)
}
  0x2e   :  { %s2179_s3 = scalar_lea.vmem %s23_s25, 128  ;;  %p2184_p6 = scmp.lt.s32.totalorder %s23_s25, %s23_s25 }
  0x2f   :  { %p2180_p5 = scmp.ne.s32.totalorder %s23_s25, %s2179_s3  ;;  %p2185_p7 = scmp.lt.s32.totalorder %s2179_s3, %s2179_s3 }
  0x31   :  { %p2186_p8 = por %p2185_p7, %p2184_p6 }
  0x33   :  { %p2187_p9 = pnand %p2186_p8, %p2180_p5 }
  0x35   :  { %2190 = shalt.err (!%p2187_p9)
}
  0x36   :  { %25 = dma.hbm_to_vmem [thread:$0]  %s2529_s0, 128, %s23_s25, [#allocation3]  }
  0x37   :  { %s2191_s15 = scalar_lea.hbm %s2531_s2, 6144 }
  0x38   :  { %p2192_p10 = scmp.ne.s32.totalorder %s2531_s2, %s2191_s15  ;;  %p2195_p11 = scmp.lt.u32.totalorder %s2191_s15, %s2531_s2 }
  0x3a   :  { %p2197_p12 = pnand %p2195_p11, %p2192_p10 }
  0x3c   :  { %2200 = shalt.err (!%p2197_p12)
}
  0x3d   :  { %s2201_s20 = scalar_lea.vmem %s2366_s27, 6144  ;;  %p2206_p0 = scmp.lt.s32.totalorder %s2366_s27, %s2366_s27 }
  0x3e   :  { %p2202_p13 = scmp.ne.s32.totalorder %s2366_s27, %s2201_s20  ;;  %p2207_p1 = scmp.lt.s32.totalorder %s2201_s20, %s2201_s20 }
  0x40   :  { %p2208_p2 = por %p2207_p1, %p2206_p0 }
  0x42   :  { %p2209_p3 = pnand %p2208_p2, %p2202_p13 }
  0x44   :  { %2212 = shalt.err (!%p2209_p3)
}
  0x45   :  { %s2297_s0 = smov 384   ;;  %s2298_s1 = smov 24  }
  0x46   :  { %49 = dma.hbm_to_vmem [thread:$0]  %s2531_s2, 6144, %s2366_s27, [#allocation6], %s2297_s0, %s2297_s0, %s2298_s1  }
  0x47   :  { %s2299_s23 = smov [#allocation10]   ;;  %s2213_s28 = scalar_lea.hbm %s2533_s4, 4096 }
  0x48   :  { %s67_s24 = sshll.u32 %s2299_s23, 4  ;;  %p2214_p4 = scmp.ne.s32.totalorder %s2533_s4, %s2213_s28  ;;  %s68_s24 = int_to_ptr.vmem [resolvable:$true] %s67_s24 }
  0x49   :  { %p2217_p5 = scmp.lt.u32.totalorder %s2213_s28, %s2533_s4 }
  0x4b   :  { %p2219_p6 = pnand %p2217_p5, %p2214_p4 }
  0x4d   :  { %2222 = shalt.err (!%p2219_p6)
}
  0x4e   :  { %s2223_s9 = scalar_lea.vmem %s68_s24, 4096  ;;  %p2228_p8 = scmp.lt.s32.totalorder %s68_s24, %s68_s24 }
  0x4f   :  { %p2224_p7 = scmp.ne.s32.totalorder %s68_s24, %s2223_s9  ;;  %p2229_p9 = scmp.lt.s32.totalorder %s2223_s9, %s2223_s9 }
  0x51   :  { %p2230_p10 = por %p2229_p9, %p2228_p8 }
  0x53   :  { %p2231_p11 = pnand %p2230_p10, %p2224_p7 }
  0x55   :  { %2234 = shalt.err (!%p2231_p11)
}
  0x56   :  { %s2300_s2 = smov 64   ;;  %s2301_s27 = smov 4  }
  0x57   :  { %73 = dma.hbm_to_vmem [thread:$0]  %s2533_s4, 4096, %s68_s24, [#allocation9], %s2300_s2, %s2300_s2, %s2301_s27  }
  0x58   :  { %s2302_s11 = smov [#allocation11]   ;;  %s2235_s15 = scalar_lea.hbm %s2534_s5, 352 }
  0x59   :  { %s80_s12 = sshll.u32 %s2302_s11, 4  ;;  %p2236_p12 = scmp.ne.s32.totalorder %s2534_s5, %s2235_s15  ;;  %s81_s12 = int_to_ptr.vmem [resolvable:$true] %s80_s12 }
  0x5a   :  { %p2239_p13 = scmp.lt.u32.totalorder %s2235_s15, %s2534_s5 }
  0x5c   :  { %p2241_p0 = pnand %p2239_p13, %p2236_p12 }
  0x5e   :  { %2244 = shalt.err (!%p2241_p0)
}
  0x5f   :  { %s2245_s20 = scalar_lea.vmem %s81_s12, 352  ;;  %p2250_p2 = scmp.lt.s32.totalorder %s81_s12, %s81_s12 }
  0x60   :  { %p2246_p1 = scmp.ne.s32.totalorder %s81_s12, %s2245_s20  ;;  %p2251_p3 = scmp.lt.s32.totalorder %s2245_s20, %s2245_s20 }
  0x62   :  { %p2252_p4 = por %p2251_p3, %p2250_p2 }
  0x64   :  { %p2253_p5 = pnand %p2252_p4, %p2246_p1 }
  0x66   :  { %2256 = shalt.err (!%p2253_p5)
}
  0x67   :  { %83 = dma.hbm_to_vmem [thread:$0]  %s2534_s5, 352, %s81_s12, [#allocation12]  }
  0x68   :  { %2279 = dma.done.wait [#allocation3], 128  }
  0x69   :  { %2280 = vsyncadd [#allocation3], 4294967168 }
  0x6a   :  { %2281 = dma.done.wait [#allocation6], 6528  }
  0x6b   :  { %2282 = vsyncadd [#allocation6], 4294960768 }
  0x6c   :  { %2283 = dma.done.wait [#allocation9], 12288  }
  0x6d   :  { %2284 = vsyncadd [#allocation9], 4294955008 }
  0x6e   :  { %2285 = dma.done.wait [#allocation12], 352  }
  0x6f   :  { %2286 = vsyncadd [#allocation12], 4294966944  ;;  %v2303_v0 = vmov 0   ;;  %v1913_v1 = vld [vmem:[#allocation5 + $0x4] ss:$12 sps:$4 sm:$0xff]   ;;  %v103_v3 = vld [vmem:[#allocation2] sm:$0xff] }
  0x70   :  { %161 = vmatprep.mubr.bf16.mxu1 %v2303_v0  ;;  %572 = vmatprep.mubr.bf16.mxu0 %v2303_v0  ;;  %v1915_v2 = vld [vmem:[#allocation5] ss:$12 sps:$4 sm:$0xff]   ;;  %v104_v4 = vpack.c.bf16 %v103_v3, %v103_v3  ;;  %vm125_vm0 = vcmask 130048   ;;  %v1916_v5 = vld [vmem:[#allocation5 + $0x8] ss:$12 sps:$4 sm:$0xff]   ;;  %v2304_v7 = vmov 0.0  }
  0x71   :  { %129 = vmatprep.subr.bf16.mxu1 %v1913_v1  ;;  %v1917_v6 = vld [vmem:[#allocation7 + $0x4] ss:$24 sps:$4 sm:$0xff]   ;;  %vm2305_vm1 = vmmov 0   ;;  %v1919_v8 = vld [vmem:[#allocation7] ss:$24 sps:$4 sm:$0xff]   ;;  %s2306_s5 = smov [#allocation13]  }
  0x72   :  { %130 = vmatpush1.bf16.msra.mxu1 %v1915_v2  ;;  %v1922_v9 = vld [vmem:[#allocation7 + $0xc] ss:$24 sps:$4 sm:$0xff]   ;;  %540 = vmatprep.subr.bf16.mxu0 %v1917_v6  ;;  %v1920_v10 = vld [vmem:[#allocation7 + $0x8] ss:$24 sps:$4 sm:$0xff]   ;;  %v1928_v22 = vld [vmem:[#allocation7 + $0x3c] ss:$24 sps:$4 sm:$0xff]  }
  0x73   :  { %1889 = vmatprep.subr.bf16.mxu1 %v2304_v7  ;;  %541 = vmatpush1.bf16.msra.mxu0 %v1919_v8  ;;  %v1695_v11 = vld [vmem:[#allocation11] ss:$0 sm:$0xff]  ;;  %v1923_v20 = vld [vmem:[#allocation7 + $0x34] ss:$24 sps:$4 sm:$0xff]   ;;  %v1925_v21 = vld [vmem:[#allocation7 + $0x30] ss:$24 sps:$4 sm:$0xff]  }
  0x74   :  { %542 = vmatprep.subr.bf16.mxu0 %v1923_v20  ;;  %v1926_v23 = vld [vmem:[#allocation7 + $0x38] ss:$24 sps:$4 sm:$0xff]   ;;  %v1929_v24 = vld [vmem:[#allocation7 + $0x64] ss:$24 sps:$4 sm:$0xff]   ;;  %v1932_v27 = vld [vmem:[#allocation7 + $0x68] ss:$24 sps:$4 sm:$0xff]  }
  0x75   :  { %1693 = vmatmul.mubr.msk.bf16.vlgmr.msra.gmra.mrb[0].mxu1 %vm125_vm0, %v104_v4  ;;  %v1931_v25 = vld [vmem:[#allocation7 + $0x60] ss:$24 sps:$4 sm:$0xff]   ;;  %v1934_v26 = vld [vmem:[#allocation7 + $0x6c] ss:$24 sps:$4 sm:$0xff]   ;;  %v1937_v29 = vld [vmem:[#allocation7 + $0x90] ss:$24 sps:$4 sm:$0xff]  }
  0x76   :  { %1891 = vmatprep.mubr.msk.bf16.mxu1 %vm2305_vm1, %v2304_v7  ;;  %1890 = vmatpush3.bf16.msra.mxu1 %v1916_v5  ;;  %v1935_v28 = vld [vmem:[#allocation7 + $0x94] ss:$24 sps:$4 sm:$0xff]   ;;  %v1938_v31 = vld [vmem:[#allocation7 + $0x98] ss:$24 sps:$4 sm:$0xff]   ;;  %v1941_v32 = vld [vmem:[#allocation7 + $0xc4] ss:$24 sps:$4 sm:$0xff]  }
  0x77   :  { %581 = vmatprep.subr.bf16.mxu1 %v1922_v9  ;;  %543 = vmatpush1.bf16.msra.mxu0 %v1925_v21  ;;  %v1940_v30 = vld [vmem:[#allocation7 + $0x9c] ss:$24 sps:$4 sm:$0xff]   ;;  %v1943_v33 = vld [vmem:[#allocation7 + $0xc0] ss:$24 sps:$4 sm:$0xff]   ;;  %v1946_v35 = vld [vmem:[#allocation7 + $0xcc] ss:$24 sps:$4 sm:$0xff]  }
  0x78   :  { %544 = vmatprep.subr.bf16.mxu0 %v1929_v24  ;;  %v1944_v34 = vld [vmem:[#allocation7 + $0xc8] ss:$24 sps:$4 sm:$0xff]   ;;  %v1947_v36 = vld [vmem:[#allocation7 + $0xf4] ss:$24 sps:$4 sm:$0xff]   ;;  %v1950_v39 = vld [vmem:[#allocation7 + $0xf8] ss:$24 sps:$4 sm:$0xff]  }
  0x79   :  { %v1952_v37 = vld [vmem:[#allocation7 + $0xfc] ss:$24 sps:$4 sm:$0xff]   ;;  %v1949_v38 = vld [vmem:[#allocation7 + $0xf0] ss:$24 sps:$4 sm:$0xff]   ;;  %v1958_v41 = vld [vmem:[#allocation7 + $0x12c] ss:$24 sps:$4 sm:$0xff]  }
  0x7a   :  { %v1953_v40 = vld [vmem:[#allocation7 + $0x124] ss:$24 sps:$4 sm:$0xff]   ;;  %v1955_v42 = vld [vmem:[#allocation7 + $0x120] ss:$24 sps:$4 sm:$0xff]   ;;  %v1959_v44 = vld [vmem:[#allocation7 + $0x154] ss:$24 sps:$4 sm:$0xff]  }
  0x7b   :  { %545 = vmatpush1.bf16.msra.mxu0 %v1931_v25  ;;  %v1956_v43 = vld [vmem:[#allocation7 + $0x128] ss:$24 sps:$4 sm:$0xff]   ;;  %v1964_v45 = vld [vmem:[#allocation7 + $0x15c] ss:$24 sps:$4 sm:$0xff]   ;;  %v1962_v47 = vld [vmem:[#allocation7 + $0x158] ss:$24 sps:$4 sm:$0xff]  }
  0x7c   :  { %546 = vmatprep.subr.bf16.mxu0 %v1935_v28  ;;  %v1961_v46 = vld [vmem:[#allocation7 + $0x150] ss:$24 sps:$4 sm:$0xff]   ;;  %v1967_v48 = vld [vmem:[#allocation7 + $0x14] ss:$24 sps:$4 sm:$0xff]   ;;  %v1696_v62 = vld [vmem:[#allocation11 + $0x1] ss:$0 sm:$0xff] }
  0x7d   :  { %1892 = vmatmul.mubr.msk.bf16.vlgmr.msra.gmra.mrb[4].mxu1 %vm125_vm0, %v104_v4  ;;  %v1697_v1 = vld [vmem:[#allocation11 + $0x2] ss:$0 sm:$0xff]  ;;  %v1965_v4 = vld [vmem:[#allocation7 + $0x10] ss:$24 sps:$4 sm:$0xff]   ;;  %v1970_v6 = vld [vmem:[#allocation7 + $0x44] ss:$24 sps:$4 sm:$0xff]  }
  0x7e   :  { %582 = vmatpush1.bf16.msra.mxu1 %v1920_v10  ;;  %613 = vmatprep.mubr.bf16.mxu1 %v2303_v0  ;;  %v1968_v7 = vld [vmem:[#allocation7 + $0x40] ss:$24 sps:$4 sm:$0xff]   ;;  %v1973_v8 = vld [vmem:[#allocation7 + $0x74] ss:$24 sps:$4 sm:$0xff]   ;;  %v1971_v9 = vld [vmem:[#allocation7 + $0x70] ss:$24 sps:$4 sm:$0xff]  }
  0x7f   :  { %583 = vmatprep.subr.bf16.mxu1 %v1928_v22  ;;  %547 = vmatpush1.bf16.msra.mxu0 %v1937_v29  ;;  %v1976_v10 = vld [vmem:[#allocation7 + $0xa4] ss:$24 sps:$4 sm:$0xff]   ;;  %v1989_v20 = vld [vmem:[#allocation8] ss:$16 sps:$4 sm:$0xff]   ;;  %v1992_v22 = vld [vmem:[#allocation8 + $0x8] ss:$16 sps:$4 sm:$0xff]  }
  0x80   :  { %548 = vmatprep.subr.bf16.mxu0 %v1941_v32  ;;  %v1991_v21 = vld [vmem:[#allocation8 + $0x4] ss:$16 sps:$4 sm:$0xff]   ;;  %v2000_v25 = vld [vmem:[#allocation8 + $0x2c] ss:$16 sps:$4 sm:$0xff]   ;;  %s1678_s1 = sshll.u32 %s2306_s5, 4  ;;  %s1679_s1 = int_to_ptr.vmem [resolvable:$true] %s1678_s1 }
  0x81   :  { %v1997_v24 = vld [vmem:[#allocation8 + $0x24] ss:$16 sps:$4 sm:$0xff]   ;;  %v2006_v29 = vld [vmem:[#allocation8 + $0x4c] ss:$16 sps:$4 sm:$0xff]   ;;  %s2257_s21 = scalar_lea.vmem %s1679_s1, 128  ;;  %p2262_p7 = scmp.lt.s32.totalorder %s1679_s1, %s1679_s1 }
  0x82   :  { %584 = vmatpush1.bf16.msra.mxu1 %v1926_v23  ;;  %v1994_v23 = vld [vmem:[#allocation8 + $0xc] ss:$16 sps:$4 sm:$0xff]   ;;  %v2003_v28 = vld [vmem:[#allocation8 + $0x44] ss:$16 sps:$4 sm:$0xff]   ;;  %p2258_p6 = scmp.ne.s32.totalorder %s1679_s1, %s2257_s21  ;;  %p2263_p8 = scmp.lt.s32.totalorder %s2257_s21, %s2257_s21 }
  0x83   :  { %585 = vmatprep.subr.bf16.mxu1 %v1934_v26  ;;  %549 = vmatpush1.bf16.msra.mxu0 %v1943_v33  ;;  %v1995_v26 = vld [vmem:[#allocation8 + $0x20] ss:$16 sps:$4 sm:$0xff]   ;;  %v2009_v32 = vld [vmem:[#allocation8 + $0x64] ss:$16 sps:$4 sm:$0xff]   ;;  %v2012_v33 = vld [vmem:[#allocation8 + $0x6c] ss:$16 sps:$4 sm:$0xff]  }
  0x84   :  { %550 = vmatprep.subr.bf16.mxu0 %v1947_v36  ;;  %v2015_v36 = vld [vmem:[#allocation8 + $0x84] ss:$16 sps:$4 sm:$0xff]   ;;  %p2264_p9 = por %p2263_p8, %p2262_p7 }
  0x86   :  { %586 = vmatpush1.bf16.msra.mxu1 %v1932_v27  ;;  %v1998_v27 = vld [vmem:[#allocation8 + $0x28] ss:$16 sps:$4 sm:$0xff]   ;;  %p2265_p10 = pnand %p2264_p9, %p2258_p6 }
  0x87   :  { %587 = vmatprep.subr.bf16.mxu1 %v1940_v30  ;;  %551 = vmatpush1.bf16.msra.mxu0 %v1949_v38  ;;  %v2001_v30 = vld [vmem:[#allocation8 + $0x40] ss:$16 sps:$4 sm:$0xff]  }
  0x88   :  { %552 = vmatprep.subr.bf16.mxu0 %v1953_v40  ;;  %v2013_v38 = vld [vmem:[#allocation8 + $0x80] ss:$16 sps:$4 sm:$0xff]   ;;  %v2021_v40 = vld [vmem:[#allocation8 + $0xa4] ss:$16 sps:$4 sm:$0xff]  }
  0x8a   :  { %588 = vmatpush1.bf16.msra.mxu1 %v1938_v31  ;;  %v2004_v31 = vld [vmem:[#allocation8 + $0x48] ss:$16 sps:$4 sm:$0xff]  }
  0x8b   :  { %589 = vmatprep.subr.bf16.mxu1 %v1946_v35  ;;  %553 = vmatpush1.bf16.msra.mxu0 %v1955_v42  ;;  %v2010_v35 = vld [vmem:[#allocation8 + $0x68] ss:$16 sps:$4 sm:$0xff]   ;;  %v2019_v42 = vld [vmem:[#allocation8 + $0xa0] ss:$16 sps:$4 sm:$0xff]  }
  0x8c   :  { %554 = vmatprep.subr.bf16.mxu0 %v1959_v44  ;;  %v2027_v44 = vld [vmem:[#allocation8 + $0xc4] ss:$16 sps:$4 sm:$0xff]  }
  0x8e   :  { %590 = vmatpush1.bf16.msra.mxu1 %v1944_v34  ;;  %v2007_v34 = vld [vmem:[#allocation8 + $0x60] ss:$16 sps:$4 sm:$0xff]  }
  0x8f   :  { %591 = vmatprep.subr.bf16.mxu1 %v1952_v37  ;;  %555 = vmatpush1.bf16.msra.mxu0 %v1961_v46  ;;  %v2018_v37 = vld [vmem:[#allocation8 + $0x8c] ss:$16 sps:$4 sm:$0xff]   ;;  %v2025_v46 = vld [vmem:[#allocation8 + $0xc0] ss:$16 sps:$4 sm:$0xff]  }
  0x90   :  { %622 = vmatprep.subr.bf16.mxu0 %v1967_v48  ;;  %v2033_v48 = vld [vmem:[#allocation8 + $0xe4] ss:$16 sps:$4 sm:$0xff]  }
  0x92   :  { %592 = vmatpush1.bf16.msra.mxu1 %v1950_v39  ;;  %v2016_v39 = vld [vmem:[#allocation8 + $0x88] ss:$16 sps:$4 sm:$0xff]  }
  0x93   :  { %593 = vmatprep.subr.bf16.mxu1 %v1958_v41  ;;  %v2024_v41 = vld [vmem:[#allocation8 + $0xac] ss:$16 sps:$4 sm:$0xff]  }
  0x96   :  { %594 = vmatpush1.bf16.msra.mxu1 %v1956_v43  ;;  %v2022_v43 = vld [vmem:[#allocation8 + $0xa8] ss:$16 sps:$4 sm:$0xff]  }
  0x97   :  { %595 = vmatprep.subr.bf16.mxu1 %v1964_v45  ;;  %v2030_v45 = vld [vmem:[#allocation8 + $0xcc] ss:$16 sps:$4 sm:$0xff]  }
  0x9a   :  { %596 = vmatpush1.bf16.msra.mxu1 %v1962_v47  ;;  %v2028_v47 = vld [vmem:[#allocation8 + $0xc8] ss:$16 sps:$4 sm:$0xff]  }
  0x9b   :  { %1118 = vmatprep.subr.bf16.mxu1 %v1991_v21  ;;  %v2043_v21 = vld [vmem:[#allocation8 + $0x120] ss:$16 sps:$4 sm:$0xff]  }
 0x148   :  { %v163_v12 = vpop.f32.mrb[0].mxu1 }
 0x149   :  { %v217_v13 = vadd.f32 %v1695_v11, %v163_v12  ;;  %v2424_v14 = vpop.f32.mrb[1].mxu1  ;;  %v1974_v11 = vld [vmem:[#allocation7 + $0xa0] ss:$24 sps:$4 sm:$0xff]   ;;  %v1979_v12 = vld [vmem:[#allocation7 + $0xd4] ss:$24 sps:$4 sm:$0xff]  }
 0x14a   :  { %v167_v15 = vpop.f32.mrb[2].mxu1 }
 0x14b   :  { %v219_v16 = vmul.f32 0.1, %v217_v13  ;;  %v168_v17 = vpop.f32.mrb[3].mxu1  ;;  %vm218_vm2 = vcmp.gt.f32.partialorder %v217_v13, 0.0  ;;  %v1982_v15 = vld [vmem:[#allocation7 + $0x104] ss:$24 sps:$4 sm:$0xff]  }
 0x14c   :  { %v1985_v17 = vld [vmem:[#allocation7 + $0x134] ss:$24 sps:$4 sm:$0xff]  }
 0x14d   :  { %v2426_v18 = vsel %vm218_vm2, %v217_v13, %v219_v16  ;;  %v1977_v13 = vld [vmem:[#allocation7 + $0xd0] ss:$24 sps:$4 sm:$0xff]   ;;  %v1980_v16 = vld [vmem:[#allocation7 + $0x100] ss:$24 sps:$4 sm:$0xff]  }
 0x14e   :  { %223 = vadd.xlane.f32.xlu0 %v2426_v18  ;;  %v227_v19 = vmul.f32 %v2426_v18, %v2426_v18 }
 0x150   :  { %v2431_v49 = vpop.f32.mrb[4].mxu1 }
 0x151   :  { %v1893_v50 = vpop.f32.mrb[5].mxu1 }
 0x152   :  { %228 = vadd.xlane.f32.xlu0 %v227_v19  ;;  %v207_v51 = vpop.f32.mrb[6].mxu1  ;;  %v1986_v19 = vld [vmem:[#allocation7 + $0x160] ss:$24 sps:$4 sm:$0xff]   ;;  %v2036_v50 = vld [vmem:[#allocation8 + $0xec] ss:$16 sps:$4 sm:$0xff]  }
 0x153   :  { %v1894_v52 = vpop.f32.mrb[7].mxu1  ;;  %v2031_v51 = vld [vmem:[#allocation8 + $0xe0] ss:$16 sps:$4 sm:$0xff]  }
 0x154   :  { %v2034_v52 = vld [vmem:[#allocation8 + $0xe8] ss:$16 sps:$4 sm:$0xff]  }
 0x1db   :  { %v224_v53 = vpop.xlane.xlu0 %223 }
 0x1dc   :  { %v226_v54 = vmul.f32 0.0078125, %v224_v53  ;;  %v2039_v53 = vld [vmem:[#allocation8 + $0x104] ss:$16 sps:$4 sm:$0xff]  }
 0x1de   :  { %v231_v56 = vmul.f32 %v226_v54, %v226_v54  ;;  %v233_v60 = vsub.f32 %v2426_v18, %v226_v54  ;;  %v1988_v18 = vld [vmem:[#allocation7 + $0x164] ss:$24 sps:$4 sm:$0xff]  }
 0x1df   :  { %v229_v55 = vpop.xlane.xlu0 %228  ;;  %v2042_v54 = vld [vmem:[#allocation8 + $0x10c] ss:$16 sps:$4 sm:$0xff]  }
 0x1e0   :  { %v230_v57 = vmul.f32 0.0078125, %v229_v55  ;;  %v2037_v55 = vld [vmem:[#allocation8 + $0x100] ss:$16 sps:$4 sm:$0xff]  }
 0x1e2   :  { %v232_v58 = vsub.f32 %v230_v57, %v231_v56  ;;  %v2040_v56 = vld [vmem:[#allocation8 + $0x108] ss:$16 sps:$4 sm:$0xff]   ;;  %v667_v57 = vlaneseq }
 0x1e4   :  { %v234_v59 = vadd.f32 1e-05, %v232_v58  ;;  %v2435_v58 = vshrl.u32 %v667_v57, 7 }
 0x1e6   :  { %2117 = vrsqrt.f32 %v234_v59  ;;  %v2438_v59 = vsub.s32 0, %v2435_v58 }
 0x1f0   :  { %v2118_v61 = vpop.eup %2117 }
 0x1f1   :  { %v236_v63 = vmul.f32 %v2118_v61, %v233_v60  ;;  %v665_v60 = vld [vmem:[#allocation11 + $0x3] sm:$0x3]  ;;  %v2441_v61 = vsub.s32 1, %v2435_v58 }
 0x1f3   :  { %v243_v2 = vmul.f32 %v1696_v62, %v236_v63  ;;  %v670_v62 = vrot.slane %v665_v60, %v2438_v59 }
 0x1f5   :  { %v250_v3 = vadd.f32 %v1697_v1, %v243_v2  ;;  %v674_v2 = vrot.slane %v665_v60, %v2441_v61 }
 0x1f7   :  { %v251_v5 = vpack.c.bf16 %v250_v3, %v250_v3 }
 0x1f9   :  { %573 = vmatmul.mubr.bf16.vlgmr.msra.gmra.mrb[0].mxu0 %v251_v5  ;;  %614 = vmatmul.mubr.bf16.vlgmr.msra.gmra.mrb[8].mxu1 %v251_v5 }
 0x1fa   :  { %623 = vmatpush1.bf16.msra.mxu0 %v1965_v4  ;;  %654 = vmatprep.mubr.bf16.mxu0 %v2303_v0  ;;  %v1983_v0 = vld [vmem:[#allocation7 + $0x130] ss:$24 sps:$4 sm:$0xff]  }
 0x1fb   :  { %624 = vmatprep.subr.bf16.mxu0 %v1970_v6  ;;  %1119 = vmatpush1.bf16.msra.mxu1 %v1989_v20  ;;  %v2048_v20 = vld [vmem:[#allocation8 + $0x12c] ss:$16 sps:$4 sm:$0xff]  }
 0x1fc   :  { %1120 = vmatprep.subr.bf16.mxu1 %v1997_v24  ;;  %v2054_v24 = vld [vmem:[#allocation8 + $0x14c] ss:$16 sps:$4 sm:$0xff]  }
 0x1fe   :  { %625 = vmatpush1.bf16.msra.mxu0 %v1968_v7 }
 0x1ff   :  { %626 = vmatprep.subr.bf16.mxu0 %v1973_v8  ;;  %1121 = vmatpush1.bf16.msra.mxu1 %v1995_v26  ;;  %v2052_v26 = vld [vmem:[#allocation8 + $0x148] ss:$16 sps:$4 sm:$0xff]  }
 0x200   :  { %1122 = vmatprep.subr.bf16.mxu1 %v2003_v28 }
 0x202   :  { %627 = vmatpush1.bf16.msra.mxu0 %v1971_v9 }
 0x203   :  { %628 = vmatprep.subr.bf16.mxu0 %v1976_v10  ;;  %1123 = vmatpush1.bf16.msra.mxu1 %v2001_v30  ;;  %v2057_v30 = vld [vmem:[#allocation8 + $0x164] ss:$16 sps:$4 sm:$0xff]  }
 0x204   :  { %1124 = vmatprep.subr.bf16.mxu1 %v2009_v32 }
 0x206   :  { %629 = vmatpush1.bf16.msra.mxu0 %v1974_v11 }
 0x207   :  { %630 = vmatprep.subr.bf16.mxu0 %v1979_v12  ;;  %1125 = vmatpush1.bf16.msra.mxu1 %v2007_v34  ;;  %v2058_v34 = vld [vmem:[#allocation8 + $0x168] ss:$16 sps:$4 sm:$0xff]  }
 0x208   :  { %1126 = vmatprep.subr.bf16.mxu1 %v2015_v36  ;;  %v2061_v36 = vld [vmem:[#allocation8 + $0x180] ss:$16 sps:$4 sm:$0xff]  }
 0x20a   :  { %631 = vmatpush1.bf16.msra.mxu0 %v1977_v13 }
 0x20b   :  { %632 = vmatprep.subr.bf16.mxu0 %v1982_v15  ;;  %1127 = vmatpush1.bf16.msra.mxu1 %v2013_v38  ;;  %v2066_v38 = vld [vmem:[#allocation8 + $0x18c] ss:$16 sps:$4 sm:$0xff]  }
 0x20c   :  { %1128 = vmatprep.subr.bf16.mxu1 %v2021_v40  ;;  %v2072_v40 = vld [vmem:[#allocation8 + $0x1ac] ss:$16 sps:$4 sm:$0xff]  }
 0x20e   :  { %633 = vmatpush1.bf16.msra.mxu0 %v1980_v16 }
 0x20f   :  { %634 = vmatprep.subr.bf16.mxu0 %v1985_v17  ;;  %1129 = vmatpush1.bf16.msra.mxu1 %v2019_v42  ;;  %v2070_v42 = vld [vmem:[#allocation8 + $0x1a8] ss:$16 sps:$4 sm:$0xff]  }
 0x210   :  { %1130 = vmatprep.subr.bf16.mxu1 %v2027_v44  ;;  %v2078_v44 = vld [vmem:[#allocation8 + $0x1cc] ss:$16 sps:$4 sm:$0xff]  }
 0x212   :  { %635 = vmatpush1.bf16.msra.mxu0 %v1983_v0 }
 0x213   :  { %636 = vmatprep.subr.bf16.mxu0 %v1988_v18  ;;  %1131 = vmatpush1.bf16.msra.mxu1 %v2025_v46  ;;  %v2076_v46 = vld [vmem:[#allocation8 + $0x1c8] ss:$16 sps:$4 sm:$0xff]  }
 0x214   :  { %1132 = vmatprep.subr.bf16.mxu1 %v2033_v48  ;;  %v2084_v48 = vld [vmem:[#allocation8 + $0x1ec] ss:$16 sps:$4 sm:$0xff]  }
 0x216   :  { %637 = vmatpush1.bf16.msra.mxu0 %v1986_v19  ;;  %v2045_v19 = vld [vmem:[#allocation8 + $0x124] ss:$16 sps:$4 sm:$0xff]  }
 0x217   :  { %1159 = vmatprep.subr.bf16.mxu0 %v1994_v23  ;;  %1133 = vmatpush1.bf16.msra.mxu1 %v2031_v51  ;;  %v2051_v23 = vld [vmem:[#allocation8 + $0x144] ss:$16 sps:$4 sm:$0xff]   ;;  %v2082_v51 = vld [vmem:[#allocation8 + $0x1e8] ss:$16 sps:$4 sm:$0xff]  }
 0x218   :  { %1134 = vmatprep.subr.bf16.mxu1 %v2039_v53 }
 0x219   :  { %655 = vmatmul.mubr.bf16.vlgmr.msra.gmra.mrb[4].mxu0 %v251_v5 }
 0x21a   :  { %1160 = vmatpush1.bf16.msra.mxu0 %v1992_v22  ;;  %v2046_v22 = vld [vmem:[#allocation8 + $0x128] ss:$16 sps:$4 sm:$0xff]  }
 0x21b   :  { %1161 = vmatprep.subr.bf16.mxu0 %v2000_v25  ;;  %1135 = vmatpush1.bf16.msra.mxu1 %v2037_v55  ;;  %v2049_v25 = vld [vmem:[#allocation8 + $0x140] ss:$16 sps:$4 sm:$0xff]  }
 0x21c   :  { %1136 = vmatprep.subr.bf16.mxu1 %v2045_v19  ;;  %v2088_v19 = vld [vmem:[#allocation10 + $0x80] sm:$0xff]  }
 0x21e   :  { %1162 = vmatpush1.bf16.msra.mxu0 %v1998_v27 }
 0x21f   :  { %1163 = vmatprep.subr.bf16.mxu0 %v2006_v29  ;;  %1137 = vmatpush1.bf16.msra.mxu1 %v2043_v21  ;;  %v1204_v21 = vld [vmem:[#allocation11 + $0x9] sm:$0xf] }
 0x220   :  { %1138 = vmatprep.subr.bf16.mxu1 %v2051_v23  ;;  %v1209_v23 = vrot.slane %v1204_v21, %v2438_v59 }
 0x222   :  { %1164 = vmatpush1.bf16.msra.mxu0 %v2004_v31  ;;  %v2060_v31 = vld [vmem:[#allocation8 + $0x16c] ss:$16 sps:$4 sm:$0xff]  }
 0x223   :  { %1165 = vmatprep.subr.bf16.mxu0 %v2012_v33  ;;  %1139 = vmatpush1.bf16.msra.mxu1 %v2049_v25  ;;  %v2055_v33 = vld [vmem:[#allocation8 + $0x160] ss:$16 sps:$4 sm:$0xff]  }
 0x224   :  { %1140 = vmatprep.subr.bf16.mxu1 %v2057_v30 }
 0x226   :  { %1166 = vmatpush1.bf16.msra.mxu0 %v2010_v35  ;;  %v2063_v35 = vld [vmem:[#allocation8 + $0x184] ss:$16 sps:$4 sm:$0xff]  }
 0x227   :  { %1167 = vmatprep.subr.bf16.mxu0 %v2018_v37  ;;  %1141 = vmatpush1.bf16.msra.mxu1 %v2055_v33  ;;  %v2064_v37 = vld [vmem:[#allocation8 + $0x188] ss:$16 sps:$4 sm:$0xff]  }
 0x228   :  { %1142 = vmatprep.subr.bf16.mxu1 %v2063_v35 }
 0x22a   :  { %1168 = vmatpush1.bf16.msra.mxu0 %v2016_v39  ;;  %v2069_v39 = vld [vmem:[#allocation8 + $0x1a4] ss:$16 sps:$4 sm:$0xff]  }
 0x22b   :  { %1169 = vmatprep.subr.bf16.mxu0 %v2024_v41  ;;  %1143 = vmatpush1.bf16.msra.mxu1 %v2061_v36  ;;  %v2067_v41 = vld [vmem:[#allocation8 + $0x1a0] ss:$16 sps:$4 sm:$0xff]  }
 0x22c   :  { %1144 = vmatprep.subr.bf16.mxu1 %v2069_v39 }
 0x22e   :  { %1170 = vmatpush1.bf16.msra.mxu0 %v2022_v43  ;;  %v2075_v43 = vld [vmem:[#allocation8 + $0x1c4] ss:$16 sps:$4 sm:$0xff]  }
 0x22f   :  { %1171 = vmatprep.subr.bf16.mxu0 %v2030_v45  ;;  %1145 = vmatpush1.bf16.msra.mxu1 %v2067_v41  ;;  %v2073_v45 = vld [vmem:[#allocation8 + $0x1c0] ss:$16 sps:$4 sm:$0xff]  }
 0x230   :  { %1146 = vmatprep.subr.bf16.mxu1 %v2075_v43 }
 0x232   :  { %1172 = vmatpush1.bf16.msra.mxu0 %v2028_v47  ;;  %v2081_v47 = vld [vmem:[#allocation8 + $0x1e4] ss:$16 sps:$4 sm:$0xff]  }
 0x233   :  { %1173 = vmatprep.subr.bf16.mxu0 %v2036_v50  ;;  %1147 = vmatpush1.bf16.msra.mxu1 %v2073_v45  ;;  %v2079_v50 = vld [vmem:[#allocation8 + $0x1e0] ss:$16 sps:$4 sm:$0xff]  }
 0x234   :  { %1148 = vmatprep.subr.bf16.mxu1 %v2081_v47 }
 0x236   :  { %1174 = vmatpush1.bf16.msra.mxu0 %v2034_v52 }
 0x237   :  { %1175 = vmatprep.subr.bf16.mxu0 %v2042_v54  ;;  %1149 = vmatpush1.bf16.msra.mxu1 %v2079_v50 }
 0x23a   :  { %1176 = vmatpush1.bf16.msra.mxu0 %v2040_v56 }
 0x23b   :  { %1177 = vmatprep.subr.bf16.mxu0 %v2048_v20  ;;  %v2472_v20 = vsub.s32 2, %v2435_v58 }
 0x23e   :  { %1178 = vmatpush1.bf16.msra.mxu0 %v2046_v22  ;;  %v2475_v22 = vsub.s32 3, %v2435_v58 }
 0x23f   :  { %1179 = vmatprep.subr.bf16.mxu0 %v2054_v24  ;;  %v1217_v24 = vrot.slane %v1204_v21, %v2472_v20 }
 0x240   :  { %v1221_v30 = vrot.slane %v1204_v21, %v2475_v22 }
 0x242   :  { %1180 = vmatpush1.bf16.msra.mxu0 %v2052_v26 }
 0x243   :  { %1181 = vmatprep.subr.bf16.mxu0 %v2060_v31 }
 0x246   :  { %1182 = vmatpush1.bf16.msra.mxu0 %v2058_v34 }
 0x247   :  { %1183 = vmatprep.subr.bf16.mxu0 %v2066_v38 }
 0x24a   :  { %1184 = vmatpush1.bf16.msra.mxu0 %v2064_v37 }
 0x24b   :  { %1185 = vmatprep.subr.bf16.mxu0 %v2072_v40 }
 0x24e   :  { %1186 = vmatpush1.bf16.msra.mxu0 %v2070_v42 }
 0x24f   :  { %1187 = vmatprep.subr.bf16.mxu0 %v2078_v44 }
 0x252   :  { %1188 = vmatpush1.bf16.msra.mxu0 %v2076_v46 }
 0x253   :  { %1189 = vmatprep.subr.bf16.mxu0 %v2084_v48 }
 0x256   :  { %1190 = vmatpush1.bf16.msra.mxu0 %v2082_v51 }
 0x2cc   :  { %v574_v63 = vpop.f32.mrb[0].mxu0  ;;  %v2444_v1 = vpop.f32.mrb[8].mxu1 }
 0x2cd   :  { %v663_v3 = vadd.f32 %v574_v63, %v2424_v14  ;;  %v576_v4 = vpop.f32.mrb[1].mxu0  ;;  %v2448_v5 = vpop.f32.mrb[9].mxu1  ;;  %v686_v63 = vld [vmem:[#allocation11 + $0x7] sm:$0x3] }
 0x2ce   :  { %v664_v6 = vadd.f32 %v576_v4, %v2431_v49  ;;  %v578_v7 = vpop.f32.mrb[2].mxu0  ;;  %v619_v8 = vpop.f32.mrb[10].mxu1 }
 0x2cf   :  { %v677_v9 = vadd.f32 %v670_v62, %v663_v3  ;;  %v579_v10 = vpop.f32.mrb[3].mxu0  ;;  %v620_v11 = vpop.f32.mrb[11].mxu1  ;;  %v685_v62 = vld [vmem:[#allocation11 + $0x5] sm:$0x3] }
 0x2d0   :  { %v678_v12 = vadd.f32 %v674_v2, %v664_v6  ;;  %v710_v4 = vrot.slane %v685_v62, %v2438_v59  ;;  %v714_v6 = vrot.slane %v685_v62, %v2441_v61  ;;  %v727_v10 = vrot.slane %v686_v63, %v2441_v61  ;;  %v2089_v62 = vld [vmem:[#allocation10 + $0x48] sm:$0xff]  }
 0x2d1   :  { %vm679_vm3 = vcmp.gt.f32.partialorder %v677_v9, 0.0  ;;  %v681_v13 = vmul.f32 0.1, %v677_v9 }
 0x2d2   :  { %vm680_vm4 = vcmp.gt.f32.partialorder %v678_v12, 0.0  ;;  %v682_v15 = vmul.f32 0.1, %v678_v12 }
 0x2d3   :  { %v2451_v16 = vsel %vm679_vm3, %v677_v9, %v681_v13  ;;  %v723_v9 = vrot.slane %v686_v63, %v2438_v59  ;;  %v2090_v63 = vld [vmem:[#allocation10 + $0xc8] sm:$0xff]  }
 0x2d4   :  { %v2453_v17 = vsel %vm680_vm4, %v678_v12, %v682_v15  ;;  %v692_v49 = vmul.f32 %v2451_v16, %v2451_v16 }
 0x2d5   :  { %v687_v14 = vadd.f32 %v2453_v17, %v2451_v16  ;;  %v693_v0 = vmul.f32 %v2453_v17, %v2453_v17 }
 0x2d7   :  { %688 = vadd.xlane.f32.xlu1 %v687_v14  ;;  %v694_v18 = vadd.f32 %v693_v0, %v692_v49 }
 0x2db   :  { %695 = vadd.xlane.f32.xlu1 %v694_v18  ;;  %v2087_v18 = vld [vmem:[#allocation10] sm:$0xff]  }
 0x2ec   :  { %v2461_v27 = vpop.f32.mrb[4].mxu0 }
 0x2ed   :  { %v2463_v28 = vpop.f32.mrb[5].mxu0 }
 0x2ee   :  { %v660_v29 = vpop.f32.mrb[6].mxu0 }
 0x2ef   :  { %v661_v32 = vpop.f32.mrb[7].mxu0  ;;  %v1213_v29 = vrot.slane %v1204_v21, %v2441_v61  ;;  %v2110_v21 = vld [vmem:[#allocation10 + $0xf0] sm:$0xff]  }
 0x364   :  { %v689_v52 = vpop.xlane.xlu1 %688 }
 0x365   :  { %v691_v53 = vmul.f32 0.00390625, %v689_v52 }
 0x367   :  { %v698_v55 = vmul.f32 %v691_v53, %v691_v53  ;;  %v700_v2 = vsub.f32 %v2451_v16, %v691_v53  ;;  %v701_v3 = vsub.f32 %v2453_v17, %v691_v53  ;;  %v2085_v16 = vld [vmem:[#allocation10 + $0x40] sm:$0xff]  }
 0x368   :  { %v696_v54 = vpop.xlane.xlu1 %695  ;;  %v2086_v17 = vld [vmem:[#allocation10 + $0xc0] sm:$0xff]   ;;  %1845 = vmatprep.subr.bf16.mxu1 %v2085_v16  ;;  %v2106_v16 = vld [vmem:[#allocation10 + $0xe8] sm:$0xff]  }
 0x369   :  { %v697_v56 = vmul.f32 0.00390625, %v696_v54  ;;  %1867 = vmatprep.subr.bf16.mxu0 %v2086_v17  ;;  %v2107_v17 = vld [vmem:[#allocation10 + $0x28] sm:$0xff]  }
 0x36b   :  { %v699_v57 = vsub.f32 %v697_v56, %v698_v55 }
 0x36d   :  { %v702_v60 = vadd.f32 1e-05, %v699_v57 }
 0x36f   :  { %2119 = vrsqrt.f32 %v702_v60 }
 0x379   :  { %v2120_v7 = vpop.eup %2119 }
 0x37a   :  { %v705_v8 = vmul.f32 %v2120_v7, %v701_v3  ;;  %v704_v11 = vmul.f32 %v2120_v7, %v700_v2  ;;  %v2091_v2 = vld [vmem:[#allocation10 + $0x8] sm:$0xff]   ;;  %v2095_v7 = vld [vmem:[#allocation10 + $0x10] sm:$0xff]  }
 0x37b   :  { %v2092_v3 = vld [vmem:[#allocation10 + $0x88] sm:$0xff]  }
 0x37c   :  { %v718_v12 = vmul.f32 %v714_v6, %v705_v8  ;;  %v717_v13 = vmul.f32 %v710_v4, %v704_v11  ;;  %v2093_v4 = vld [vmem:[#allocation10 + $0x50] sm:$0xff]   ;;  %v2099_v11 = vld [vmem:[#allocation10 + $0x18] sm:$0xff]  }
 0x37d   :  { %v2094_v6 = vld [vmem:[#allocation10 + $0xd0] sm:$0xff]  }
 0x37e   :  { %v731_v15 = vadd.f32 %v727_v10, %v718_v12  ;;  %v730_v14 = vadd.f32 %v723_v9, %v717_v13  ;;  %v2096_v8 = vld [vmem:[#allocation10 + $0x90] sm:$0xff]   ;;  %v2097_v9 = vld [vmem:[#allocation10 + $0x58] sm:$0xff]   ;;  %v2101_v13 = vld [vmem:[#allocation10 + $0x60] sm:$0xff]  }
 0x37f   :  { %v2098_v10 = vld [vmem:[#allocation10 + $0xd8] sm:$0xff]  }
 0x380   :  { %v733_v49 = vpack.c.bf16 %v731_v15, %v731_v15  ;;  %v732_v0 = vpack.c.bf16 %v730_v14, %v730_v14  ;;  %v2100_v12 = vld [vmem:[#allocation10 + $0x98] sm:$0xff]   ;;  %v2102_v15 = vld [vmem:[#allocation10 + $0xe0] sm:$0xff]  }
 0x381   :  { %v2103_v14 = vld [vmem:[#allocation10 + $0x20] sm:$0xff]  }
 0x382   :  { %1150 = vmatprep.mubr.bf16.mxu1 %v733_v49  ;;  %1191 = vmatprep.mubr.bf16.mxu0 %v733_v49  ;;  %v2104_v49 = vld [vmem:[#allocation10 + $0xa0] sm:$0xff]  }
 0x383   :  { %1151 = vmatmul.mubr.bf16.vlgmr.msra.gmra.mrb[12].mxu1 %v732_v0  ;;  %1192 = vmatmul.mubr.bf16.vlgmr.msra.gmra.mrb[8].mxu0 %v732_v0  ;;  %v2105_v0 = vld [vmem:[#allocation10 + $0x68] sm:$0xff]  }
 0x384   :  { %1846 = vmatpush3.bf16.msra.mxu1 %v2087_v18  ;;  %1868 = vmatpush3.bf16.msra.mxu0 %v2088_v19  ;;  %v2108_v18 = vld [vmem:[#allocation10 + $0xa8] sm:$0xff]   ;;  %v2109_v19 = vld [vmem:[#allocation10 + $0x70] sm:$0xff]  }
 0x385   :  { %1847 = vmatprep.subr.bf16.mxu1 %v2089_v62  ;;  %1869 = vmatprep.subr.bf16.mxu0 %v2090_v63 }
 0x388   :  { %1848 = vmatpush3.bf16.msra.mxu1 %v2091_v2  ;;  %1870 = vmatpush3.bf16.msra.mxu0 %v2092_v3 }
 0x389   :  { %1849 = vmatprep.subr.bf16.mxu1 %v2093_v4  ;;  %1871 = vmatprep.subr.bf16.mxu0 %v2094_v6  ;;  %v1810_v4 = vld [vmem:[#allocation11 + $0x15] ss:$0 sm:$0xff] }
 0x38c   :  { %1850 = vmatpush3.bf16.msra.mxu1 %v2095_v7  ;;  %1872 = vmatpush3.bf16.msra.mxu0 %v2096_v8 }
 0x38d   :  { %1851 = vmatprep.subr.bf16.mxu1 %v2097_v9  ;;  %1873 = vmatprep.subr.bf16.mxu0 %v2098_v10 }
 0x390   :  { %1852 = vmatpush3.bf16.msra.mxu1 %v2099_v11  ;;  %1874 = vmatpush3.bf16.msra.mxu0 %v2100_v12 }
 0x391   :  { %1853 = vmatprep.subr.bf16.mxu1 %v2101_v13  ;;  %1875 = vmatprep.subr.bf16.mxu0 %v2102_v15 }
 0x394   :  { %1854 = vmatpush3.bf16.msra.mxu1 %v2103_v14  ;;  %1876 = vmatpush3.bf16.msra.mxu0 %v2104_v49 }
 0x395   :  { %1855 = vmatprep.subr.bf16.mxu1 %v2105_v0  ;;  %1877 = vmatprep.subr.bf16.mxu0 %v2106_v16 }
 0x398   :  { %1856 = vmatpush3.bf16.msra.mxu1 %v2107_v17  ;;  %1878 = vmatpush3.bf16.msra.mxu0 %v2108_v18 }
 0x399   :  { %1857 = vmatprep.subr.bf16.mxu1 %v2109_v19  ;;  %1879 = vmatprep.subr.bf16.mxu0 %v2110_v21 }
 0x456   :  { %v1152_v25 = vpop.f32.mrb[12].mxu1  ;;  %v1193_v26 = vpop.f32.mrb[8].mxu0 }
 0x457   :  { %v1200_v31 = vadd.f32 %v1152_v25, %v2444_v1  ;;  %v1202_v32 = vadd.f32 %v1193_v26, %v2461_v27  ;;  %v1154_v33 = vpop.f32.mrb[13].mxu1  ;;  %v1195_v34 = vpop.f32.mrb[9].mxu0  ;;  %v2113_v25 = vld [vmem:[#allocation10 + $0x78] sm:$0xff]  }
 0x458   :  { %v1201_v35 = vadd.f32 %v1154_v33, %v2448_v5  ;;  %v1203_v58 = vadd.f32 %v1195_v34, %v2463_v28  ;;  %v1156_v36 = vpop.f32.mrb[14].mxu1  ;;  %v1197_v37 = vpop.f32.mrb[10].mxu0  ;;  %v2114_v26 = vld [vmem:[#allocation10 + $0xf8] sm:$0xff]  }
 0x459   :  { %v1226_v38 = vadd.f32 %v1209_v23, %v1200_v31  ;;  %v1228_v39 = vadd.f32 %v1217_v24, %v1202_v32  ;;  %v1157_v40 = vpop.f32.mrb[15].mxu1  ;;  %v1198_v41 = vpop.f32.mrb[11].mxu0  ;;  %v2111_v23 = vld [vmem:[#allocation10 + $0x30] sm:$0xff]  }
 0x45a   :  { %v1227_v42 = vadd.f32 %v1213_v29, %v1201_v35  ;;  %v1229_v43 = vadd.f32 %v1221_v30, %v1203_v58  ;;  %v2112_v24 = vld [vmem:[#allocation10 + $0xb0] sm:$0xff]   ;;  %1858 = vmatpush3.bf16.msra.mxu1 %v2111_v23  ;;  %v2115_v29 = vld [vmem:[#allocation10 + $0x38] sm:$0xff]  }
 0x45b   :  { %vm1230_vm5 = vcmp.gt.f32.partialorder %v1226_v38, 0.0  ;;  %v1234_v44 = vmul.f32 0.1, %v1226_v38  ;;  %vm1232_vm6 = vcmp.gt.f32.partialorder %v1228_v39, 0.0  ;;  %v1236_v1 = vmul.f32 0.1, %v1228_v39  ;;  %1880 = vmatpush3.bf16.msra.mxu0 %v2112_v24  ;;  %1859 = vmatprep.subr.bf16.mxu1 %v2113_v25 }
 0x45c   :  { %vm1231_vm7 = vcmp.gt.f32.partialorder %v1227_v42, 0.0  ;;  %v1235_v27 = vmul.f32 0.1, %v1227_v42  ;;  %v1237_v45 = vmul.f32 0.1, %v1229_v43  ;;  %vm1233_vm8 = vcmp.gt.f32.partialorder %v1229_v43, 0.0  ;;  %1881 = vmatprep.subr.bf16.mxu0 %v2114_v26 }
 0x45d   :  { %v2485_v46 = vsel %vm1230_vm5, %v1226_v38, %v1234_v44  ;;  %v2489_v28 = vsel %vm1232_vm6, %v1228_v39, %v1236_v1  ;;  %v2116_v30 = vld [vmem:[#allocation10 + $0xb8] sm:$0xff]   ;;  %v1242_v37 = vld [vmem:[#allocation11 + $0xd] sm:$0xf]  ;;  %v1243_v38 = vld [vmem:[#allocation11 + $0x11] sm:$0xf] }
 0x45e   :  { %v2487_v5 = vsel %vm1231_vm7, %v1227_v42, %v1235_v27  ;;  %v1251_v47 = vmul.f32 %v2485_v46, %v2485_v46  ;;  %v2497_v51 = vsel %vm1233_vm8, %v1229_v43, %v1237_v45  ;;  %v1253_v53 = vmul.f32 %v2489_v28, %v2489_v28  ;;  %1860 = vmatpush3.bf16.msra.mxu1 %v2115_v29 }
 0x45f   :  { %v1244_v48 = vadd.f32 %v2487_v5, %v2485_v46  ;;  %v1252_v50 = vmul.f32 %v2487_v5, %v2487_v5  ;;  %v1254_v56 = vmul.f32 %v2497_v51, %v2497_v51  ;;  %1882 = vmatpush3.bf16.msra.mxu0 %v2116_v30  ;;  %v1281_v39 = vrot.slane %v1242_v37, %v2441_v61 }
 0x460   :  { %v1289_v40 = vrot.slane %v1242_v37, %v2475_v22  ;;  %v1277_v41 = vrot.slane %v1242_v37, %v2438_v59  ;;  %v1285_v42 = vrot.slane %v1242_v37, %v2472_v20 }
 0x461   :  { %v1245_v52 = vadd.f32 %v1244_v48, %v2489_v28  ;;  %v1255_v54 = vadd.f32 %v1252_v50, %v1251_v47  ;;  %v1306_v47 = vrot.slane %v1243_v38, %v2441_v61  ;;  %v1314_v48 = vrot.slane %v1243_v38, %v2475_v22 }
 0x462   :  { %v1302_v50 = vrot.slane %v1243_v38, %v2438_v59 }
 0x463   :  { %v1246_v55 = vadd.f32 %v1245_v52, %v2497_v51  ;;  %v1256_v57 = vadd.f32 %v1255_v54, %v1253_v53  ;;  %v1310_v52 = vrot.slane %v1243_v38, %v2472_v20 }
 0x465   :  { %1247 = vadd.xlane.f32.xlu0 %v1246_v55  ;;  %v1257_v60 = vadd.f32 %v1256_v57, %v1254_v56 }
 0x467   :  { %1258 = vadd.xlane.f32.xlu1 %v1257_v60 }
 0x4f2   :  { %v1248_v31 = vpop.xlane.xlu0 %1247 }
 0x4f3   :  { %v1250_v32 = vmul.f32 0.001953125, %v1248_v31 }
 0x4f4   :  { %v1259_v33 = vpop.xlane.xlu1 %1258 }
 0x4f5   :  { %v1260_v34 = vmul.f32 0.001953125, %v1259_v33  ;;  %v1261_v35 = vmul.f32 %v1250_v32, %v1250_v32  ;;  %v1263_v43 = vsub.f32 %v2485_v46, %v1250_v32  ;;  %v1265_v44 = vsub.f32 %v2489_v28, %v1250_v32 }
 0x4f6   :  { %v1264_v1 = vsub.f32 %v2487_v5, %v1250_v32  ;;  %v1266_v27 = vsub.f32 %v2497_v51, %v1250_v32 }
 0x4f7   :  { %v1262_v58 = vsub.f32 %v1260_v34, %v1261_v35 }
 0x4f9   :  { %v1267_v36 = vadd.f32 1e-05, %v1262_v58 }
 0x4fb   :  { %2121 = vrsqrt.f32 %v1267_v36 }
 0x505   :  { %v2122_v45 = vpop.eup %2121 }
 0x506   :  { %v1270_v53 = vmul.f32 %v2122_v45, %v1264_v1  ;;  %v1272_v54 = vmul.f32 %v2122_v45, %v1266_v27  ;;  %v1269_v55 = vmul.f32 %v2122_v45, %v1263_v43  ;;  %v1271_v56 = vmul.f32 %v2122_v45, %v1265_v44 }
 0x508   :  { %v1295_v46 = vmul.f32 %v1281_v39, %v1270_v53  ;;  %v1297_v57 = vmul.f32 %v1289_v40, %v1272_v54  ;;  %v1294_v28 = vmul.f32 %v1277_v41, %v1269_v55  ;;  %v1296_v60 = vmul.f32 %v1285_v42, %v1271_v56 }
 0x50a   :  { %v1320_v5 = vadd.f32 %v1306_v47, %v1295_v46  ;;  %v1322_v62 = vadd.f32 %v1314_v48, %v1297_v57  ;;  %v1319_v51 = vadd.f32 %v1302_v50, %v1294_v28  ;;  %v1321_v63 = vadd.f32 %v1310_v52, %v1296_v60 }
 0x50c   :  { %v1324_v2 = vpack.c.bf16 %v1320_v5, %v1320_v5  ;;  %v1326_v61 = vpack.c.bf16 %v1322_v62, %v1322_v62  ;;  %v1323_v3 = vpack.c.bf16 %v1319_v51, %v1319_v51  ;;  %v1325_v22 = vpack.c.bf16 %v1321_v63, %v1321_v63 }
 0x50e   :  { %1622 = vmatprep.mubr.bf16.mxu1 %v1324_v2  ;;  %1662 = vmatprep.mubr.bf16.mxu0 %v1326_v61 }
 0x50f   :  { %1623 = vmatmul.mubr.bf16.vlgmr.msra.gmra.mrb[16].mxu1 %v1323_v3  ;;  %1663 = vmatmul.mubr.bf16.vlgmr.msra.gmra.mrb[12].mxu0 %v1325_v22 }
 0x5e2   :  { %v1861_v59 = vpop.f32.mrb[16].mxu1  ;;  %v1883_v20 = vpop.f32.mrb[12].mxu0 }
 0x5e3   :  { %v1862_v6 = vpop.f32.mrb[17].mxu1  ;;  %v1884_v7 = vpop.f32.mrb[13].mxu0 }
 0x5e4   :  { %v1863_v8 = vadd.f32 %v1862_v6, %v1861_v59  ;;  %v1885_v9 = vadd.f32 %v1884_v7, %v1883_v20  ;;  %v1864_v10 = vpop.f32.mrb[18].mxu1  ;;  %v1886_v11 = vpop.f32.mrb[14].mxu0 }
 0x5e5   :  { %v1865_v12 = vpop.f32.mrb[19].mxu1  ;;  %v1887_v13 = vpop.f32.mrb[15].mxu0 }
 0x5e6   :  { %v1625_v15 = vadd.f32 %v1863_v8, %v1810_v4 }
 0x5e8   :  { %v1665_v14 = vadd.f32 %v1885_v9, %v1625_v15 }
 0x5ea   :  { %2123 = vtanh.f32 %v1665_v14 }
 0x5f4   :  { %v2124_v49 = vpop.eup %2123 }
 0x5f5   :  { %1671 = vst [vmem:[#allocation13] sm:$0xff] %v2124_v49 }
 0x5f6   :  { %2268 = shalt.err (!%p2265_p10)
}
 0x5f7   :  { %s2269_s24 = scalar_lea.hbm %s2535_s6, 128 }
 0x5f8   :  { %p2270_p11 = scmp.ne.s32.totalorder %s2535_s6, %s2269_s24  ;;  %p2273_p12 = scmp.lt.u32.totalorder %s2269_s24, %s2535_s6 }
 0x5fa   :  { %p2275_p13 = pnand %p2273_p12, %p2270_p11 }
 0x5fc   :  { %2278 = shalt.err (!%p2275_p13)
}
 0x5fd   :  { %1681 = dma.vmem_to_hbm [thread:$0]  %s1679_s1, 128, %s2535_s6, [#allocation4]  }
 0x5fe   :  { %2287 = dma.done.wait [#allocation4], 128  }
 0x5ff   :  { %2288 = vsyncadd [#allocation4], 4294967168 }
 0x600   :  { %1685 = vsyncpa [#allocation3], 1 }
 0x601   :  { %1686 = vsyncpa [#allocation6], 1 }
 0x602   :  { %1687 = vsyncpa [#allocation9], 1 }
 0x603   :  { %1688 = vsyncpa [#allocation12], 1 }
 0x604   :  { %1689 = vsyncpa [#allocation4], 1 }

</bundles_post_ra>
